<compile_context>
chip_gen: v5e
topology: v5e:2x2
jax: 0.10.0
libtpu: 0.0.40
codegen_flags: <defaults>
</compile_context>

<pallas_src>
import jax
import jax.numpy as jnp
from jax.experimental import pallas as pl
from jax.experimental.pallas import tpu as pltpu

EPS = 1e-5
_VMEM_LIMIT = 48 * 1024 * 1024  # headroom under v7x's 64 MiB physical VMEM


def _layer1_kernel(x_ref, w1_ref, b1_ref, h_ref, sum_ref, ssq_ref):
    """h_pre = x @ W1 + b1 per batch tile; accumulate per-feature sum / sumsq."""
    i = pl.program_id(0)

    @pl.when(i == 0)
    def _():
        sum_ref[...] = jnp.zeros_like(sum_ref)
        ssq_ref[...] = jnp.zeros_like(ssq_ref)

    x = x_ref[...].astype(jnp.bfloat16)                       # bf16 MXU operand
    h = jnp.dot(x, w1_ref[...], preferred_element_type=jnp.float32)
    h = h + b1_ref[...]                                       # f32 epilogue math
    h_ref[...] = h
    sum_ref[...] += jnp.sum(h, axis=0, keepdims=True)
    ssq_ref[...] += jnp.sum(h * h, axis=0, keepdims=True)


def _layer2_kernel(h_ref, scale_ref, shift_ref, w2_ref, b2_ref, o_ref):
    """Folded BN affine + ReLU, then y = h @ W2 + b2 (no BN / no ReLU on output)."""
    h = h_ref[...] * scale_ref[...] + shift_ref[...]          # folded BN: mul + add
    h = jnp.maximum(h, 0.0).astype(jnp.bfloat16)              # ReLU -> bf16 operand
    y = jnp.dot(h, w2_ref[...], preferred_element_type=jnp.float32)
    o_ref[...] = (y + b2_ref[...]).astype(o_ref.dtype)


def prediction_mlp_forward(x, params, *, batch_tile=256):
    """x: (N, in_dim) float32. params: see init_params (pre-transposed bf16 weights)."""
    N, in_dim = x.shape
    hidden = params["w1"].shape[1]
    out_dim = params["w2"].shape[1]

    # Lane-dense layout checks (avoid masked partial stores / lane-sparse vregs).
    assert in_dim % 128 == 0 and hidden % 128 == 0 and out_dim % 128 == 0, \
        "feature dims must be multiples of 128 (pad in the caller)"
    tb = batch_tile if (N % batch_tile == 0) else N
    assert tb == N or tb % 8 == 0, "batch tile must be a multiple of 8"
    num_tiles = N // tb

    cp_reduce = pltpu.CompilerParams(
        dimension_semantics=("arbitrary",),   # stats accumulate across batch tiles
        vmem_limit_bytes=_VMEM_LIMIT)
    cp_parallel = pltpu.CompilerParams(
        dimension_semantics=("parallel",),    # independent tiles -> megacore on v7x
        vmem_limit_bytes=_VMEM_LIMIT)

    # ---- pass 1: Linear(in -> hidden) + batch-statistic accumulation ----
    h_pre, h_sum, h_ssq = pl.pallas_call(
        _layer1_kernel,
        grid=(num_tiles,),
        in_specs=[
            pl.BlockSpec((tb, in_dim), lambda i: (i, 0)),
            pl.BlockSpec((in_dim, hidden), lambda i: (0, 0)),   # grid-invariant weight
            pl.BlockSpec((1, hidden), lambda i: (0, 0)),
        ],
        out_specs=[
            pl.BlockSpec((tb, hidden), lambda i: (i, 0)),
            pl.BlockSpec((1, hidden), lambda i: (0, 0)),        # VMEM-resident accumulator
            pl.BlockSpec((1, hidden), lambda i: (0, 0)),
        ],
        out_shape=[
            jax.ShapeDtypeStruct((N, hidden), jnp.float32),
            jax.ShapeDtypeStruct((1, hidden), jnp.float32),
            jax.ShapeDtypeStruct((1, hidden), jnp.float32),
        ],
        compiler_params=cp_reduce,
    )(x, params["w1"], params["b1"])

    # ---- fold training-mode BatchNorm1d into a single per-feature affine ----
    inv_n = 1.0 / N
    mean = h_sum * inv_n
    var = jnp.maximum(h_ssq * inv_n - mean * mean, 0.0)        # biased variance
    scale = params["gamma1"] * jax.lax.rsqrt(var + EPS)
    shift = params["beta1"] - mean * scale

    # ---- pass 2: BN affine + ReLU + Linear(hidden -> out) ----
    y = pl.pallas_call(
        _layer2_kernel,
        grid=(num_tiles,),
        in_specs=[
            pl.BlockSpec((tb, hidden), lambda i: (i, 0)),
            pl.BlockSpec((1, hidden), lambda i: (0, 0)),
            pl.BlockSpec((1, hidden), lambda i: (0, 0)),
            pl.BlockSpec((hidden, out_dim), lambda i: (0, 0)),  # grid-invariant weight
            pl.BlockSpec((1, out_dim), lambda i: (0, 0)),
        ],
        out_specs=pl.BlockSpec((tb, out_dim), lambda i: (i, 0)),
        out_shape=jax.ShapeDtypeStruct((N, out_dim), jnp.float32),
        compiler_params=cp_parallel,
    )(h_pre, scale, shift, params["w2"], params["b2"])
    return y


def init_params(key, in_dim, hidden_dim, out_dim):
    k1, k2, k3, k4 = jax.random.split(key, 4)
    # Pre-transposed, bf16 weights: w1 is (in_dim, hidden), w2 is (hidden, out_dim).
    w1 = (jax.random.normal(k1, (in_dim, hidden_dim), jnp.float32)
          / jnp.sqrt(in_dim)).astype(jnp.bfloat16)
    b1 = (jax.random.uniform(k2, (1, hidden_dim), jnp.float32) - 0.5) / jnp.sqrt(in_dim)
    w2 = (jax.random.normal(k3, (hidden_dim, out_dim), jnp.float32)
          / jnp.sqrt(hidden_dim)).astype(jnp.bfloat16)
    b2 = (jax.random.uniform(k4, (1, out_dim), jnp.float32) - 0.5) / jnp.sqrt(hidden_dim)
    # BatchNorm1d affine params (PyTorch default init: gamma=1, beta=0).
    return dict(
        w1=w1, b1=b1,
        gamma1=jnp.ones((1, hidden_dim), jnp.float32),
        beta1=jnp.zeros((1, hidden_dim), jnp.float32),
        w2=w2, b2=b2,
    )


def _reference_forward(x, p):
    # Pure-JAX reference mirroring the kernel's bf16-operand / f32-accumulate matmuls.
    h = jnp.dot(x.astype(jnp.bfloat16), p["w1"],
                preferred_element_type=jnp.float32) + p["b1"]
    m = h.mean(0, keepdims=True)
    v = ((h - m) ** 2).mean(0, keepdims=True)
    h = (h - m) * jax.lax.rsqrt(v + EPS) * p["gamma1"] + p["beta1"]
    h = jnp.maximum(h, 0.0)
    y = jnp.dot(h.astype(jnp.bfloat16), p["w2"],
                preferred_element_type=jnp.float32) + p["b2"]
    return y


if __name__ == "__main__":
    key = jax.random.PRNGKey(0)
    kx, kp = jax.random.split(key)

    # Small but lane-dense shapes: feature dims multiples of 128, batch multiple of 8.
    batch, in_dim, hidden_dim, out_dim = 64, 128, 256, 128
    x = jax.random.normal(kx, (batch, in_dim), jnp.float32)
    params = init_params(kp, in_dim, hidden_dim, out_dim)

    out = prediction_mlp_forward(x, params, batch_tile=16)   # 4 grid steps
    out = jax.block_until_ready(out)

    ref = _reference_forward(x, params)
    assert out.shape == (batch, out_dim)
    assert jnp.allclose(out, ref, atol=2e-2, rtol=2e-2), "mismatch vs pure-JAX reference"
    print("KERNEL_OK")
</pallas_src>

<mosaic_0001>
module attributes {stable_mosaic.version = 11 : i64} {
  func.func @_layer1_kernel(%arg0: i32, %arg1: memref<16x128xf32, #tpu.memory_space<vmem>>, %arg2: memref<128x256xbf16, #tpu.memory_space<vmem>>, %arg3: memref<1x256xf32, #tpu.memory_space<vmem>>, %arg4: memref<16x256xf32, #tpu.memory_space<vmem>>, %arg5: memref<1x256xf32, #tpu.memory_space<vmem>>, %arg6: memref<1x256xf32, #tpu.memory_space<vmem>>) attributes {dimension_semantics = [#tpu.dimension_semantics<arbitrary>], iteration_bounds = array<i64: 4>, scalar_prefetch = 0 : i64, scratch_operands = 0 : i64, tpu.core_type = #tpu.core_type<tc>, window_params = [{transform_indices = @transform_0, window_bounds = array<i64: 16, 128>}, {pipeline_mode = #tpu.pipeline_mode<synchronous>, transform_indices = @transform_1, window_bounds = array<i64: 128, 256>}, {pipeline_mode = #tpu.pipeline_mode<synchronous>, transform_indices = @transform_2, window_bounds = array<i64: 1, 256>}, {transform_indices = @transform_3, window_bounds = array<i64: 16, 256>}, {pipeline_mode = #tpu.pipeline_mode<synchronous>, transform_indices = @transform_4, window_bounds = array<i64: 1, 256>}, {pipeline_mode = #tpu.pipeline_mode<synchronous>, transform_indices = @transform_5, window_bounds = array<i64: 1, 256>}]} {
    %c0_i32 = arith.constant 0 : i32
    %0 = arith.cmpi eq, %arg0, %c0_i32 : i32
    %1 = arith.extui %0 : i1 to i32
    %c0_i32_0 = arith.constant 0 : i32
    %2 = arith.cmpi ne, %1, %c0_i32_0 : i32
    scf.if %2 {
      %cst_18 = arith.constant 0.000000e+00 : f32
      %22 = vector.broadcast %cst_18 : f32 to vector<1x256xf32>
      %c0_19 = arith.constant 0 : index
      %c0_20 = arith.constant 0 : index
      %23 = vector.load %arg5[%c0_19, %c0_20] : memref<1x256xf32, #tpu.memory_space<vmem>>, vector<1x256xf32>
      tpu.vector_store %arg5[%c0_19, %c0_20], %22 {strides = array<i32>} : memref<1x256xf32, #tpu.memory_space<vmem>>, vector<1x256xf32>,
      %cst_21 = arith.constant 0.000000e+00 : f32
      %24 = vector.broadcast %cst_21 : f32 to vector<1x256xf32>
      %c0_22 = arith.constant 0 : index
      %c0_23 = arith.constant 0 : index
      %25 = vector.load %arg6[%c0_22, %c0_23] : memref<1x256xf32, #tpu.memory_space<vmem>>, vector<1x256xf32>
      tpu.vector_store %arg6[%c0_22, %c0_23], %24 {strides = array<i32>} : memref<1x256xf32, #tpu.memory_space<vmem>>, vector<1x256xf32>,
    } else {
    }
    %c0 = arith.constant 0 : index
    %c0_1 = arith.constant 0 : index
    %3 = vector.load %arg1[%c0, %c0_1] : memref<16x128xf32, #tpu.memory_space<vmem>>, vector<16x128xf32>
    %4 = arith.truncf %3 : vector<16x128xf32> to vector<16x128xbf16>
    %c0_2 = arith.constant 0 : index
    %c0_3 = arith.constant 0 : index
    %5 = vector.load %arg2[%c0_2, %c0_3] : memref<128x256xbf16, #tpu.memory_space<vmem>>, vector<128x256xbf16>
    %cst = arith.constant dense<0.000000e+00> : vector<16x256xf32>
    %6 = tpu.matmul %4, %5, %cst {dimension_numbers = #tpu.dot_dimension_numbers<[1], [0], [0], [1], [0, 0, 1, 1], [], []>} : vector<16x128xbf16>, vector<128x256xbf16>, vector<16x256xf32> -> vector<16x256xf32>
    %c0_4 = arith.constant 0 : index
    %c0_5 = arith.constant 0 : index
    %7 = vector.load %arg3[%c0_4, %c0_5] : memref<1x256xf32, #tpu.memory_space<vmem>>, vector<1x256xf32>
    %8 = vector.broadcast %7 : vector<1x256xf32> to vector<16x256xf32>
    %9 = arith.addf %6, %8 : vector<16x256xf32>
    %c0_6 = arith.constant 0 : index
    %c0_7 = arith.constant 0 : index
    %10 = vector.load %arg4[%c0_6, %c0_7] : memref<16x256xf32, #tpu.memory_space<vmem>>, vector<16x256xf32>
    tpu.vector_store %arg4[%c0_6, %c0_7], %9 {strides = array<i32>} : memref<16x256xf32, #tpu.memory_space<vmem>>, vector<16x256xf32>,
    %c0_8 = arith.constant 0 : index
    %c0_9 = arith.constant 0 : index
    %11 = vector.load %arg5[%c0_8, %c0_9] : memref<1x256xf32, #tpu.memory_space<vmem>>, vector<1x256xf32>
    %cst_10 = arith.constant dense<0.000000e+00> : vector<256xf32>
    %12 = vector.multi_reduction <add>, %9, %cst_10 [0] : vector<16x256xf32> to vector<256xf32>
    %13 = vector.shape_cast %12 : vector<256xf32> to vector<1x256xf32>
    %14 = arith.addf %11, %13 : vector<1x256xf32>
    %c0_11 = arith.constant 0 : index
    %c0_12 = arith.constant 0 : index
    %15 = vector.load %arg5[%c0_11, %c0_12] : memref<1x256xf32, #tpu.memory_space<vmem>>, vector<1x256xf32>
    tpu.vector_store %arg5[%c0_11, %c0_12], %14 {strides = array<i32>} : memref<1x256xf32, #tpu.memory_space<vmem>>, vector<1x256xf32>,
    %c0_13 = arith.constant 0 : index
    %c0_14 = arith.constant 0 : index
    %16 = vector.load %arg6[%c0_13, %c0_14] : memref<1x256xf32, #tpu.memory_space<vmem>>, vector<1x256xf32>
    %17 = arith.mulf %9, %9 : vector<16x256xf32>
    %cst_15 = arith.constant dense<0.000000e+00> : vector<256xf32>
    %18 = vector.multi_reduction <add>, %17, %cst_15 [0] : vector<16x256xf32> to vector<256xf32>
    %19 = vector.shape_cast %18 : vector<256xf32> to vector<1x256xf32>
    %20 = arith.addf %16, %19 : vector<1x256xf32>
    %c0_16 = arith.constant 0 : index
    %c0_17 = arith.constant 0 : index
    %21 = vector.load %arg6[%c0_16, %c0_17] : memref<1x256xf32, #tpu.memory_space<vmem>>, vector<1x256xf32>
    tpu.vector_store %arg6[%c0_16, %c0_17], %20 {strides = array<i32>} : memref<1x256xf32, #tpu.memory_space<vmem>>, vector<1x256xf32>,
    return
  }
  func.func @transform_0(%arg0: i32) -> (i32, i32) {
    %c0_i32 = arith.constant 0 : i32
    %c0_i32_0 = arith.constant 0 : i32
    return %arg0, %c0_i32 : i32, i32
  }
  func.func @transform_1(%arg0: i32) -> (i32, i32) {
    %c0_i32 = arith.constant 0 : i32
    %c0_i32_0 = arith.constant 0 : i32
    %c0_i32_1 = arith.constant 0 : i32
    return %c0_i32, %c0_i32_0 : i32, i32
  }
  func.func @transform_2(%arg0: i32) -> (i32, i32) {
    %c0_i32 = arith.constant 0 : i32
    %c0_i32_0 = arith.constant 0 : i32
    %c0_i32_1 = arith.constant 0 : i32
    return %c0_i32, %c0_i32_0 : i32, i32
  }
  func.func @transform_3(%arg0: i32) -> (i32, i32) {
    %c0_i32 = arith.constant 0 : i32
    %c0_i32_0 = arith.constant 0 : i32
    return %arg0, %c0_i32 : i32, i32
  }
  func.func @transform_4(%arg0: i32) -> (i32, i32) {
    %c0_i32 = arith.constant 0 : i32
    %c0_i32_0 = arith.constant 0 : i32
    %c0_i32_1 = arith.constant 0 : i32
    return %c0_i32, %c0_i32_0 : i32, i32
  }
  func.func @transform_5(%arg0: i32) -> (i32, i32) {
    %c0_i32 = arith.constant 0 : i32
    %c0_i32_0 = arith.constant 0 : i32
    %c0_i32_1 = arith.constant 0 : i32
    return %c0_i32, %c0_i32_0 : i32, i32
  }
}

</mosaic_0001>

<bundles_post_ra>
// kernel: tpu_custom_call.1
= control target key start
LH: loop header
LB: loop body
LE: loop exit
PB: predicated region body
PF: predicated region fallthrough
CT: control target
= control target key end

     0   :  { %11 = vsyncpa [#allocation3], 0  ;;  %s1275_s0 = inlined_call_operand.hbm [shape: f32[64,128], index: 0, kind: input, shape index: {}]   ;;  %s1276_s1 = inlined_call_operand.hbm [shape: bf16[128,256], index: 1, kind: input, shape index: {}]   ;;  %s1277_s2 = inlined_call_operand.hbm [shape: f32[1,256], index: 2, kind: input, shape index: {}]   ;;  %s1278_s3 = inlined_call_operand.hbm [shape: f32[64,256], index: 3, kind: output, shape index: {0}]   ;;  %s1279_s4 = inlined_call_operand.hbm [shape: f32[1,256], index: 4, kind: output, shape index: {1}]   ;;  %s1280_s5 = inlined_call_operand.hbm [shape: f32[1,256], index: 5, kind: output, shape index: {2}]  }
   0x1   :  { %13 = vsyncpa [#allocation3 + $0x1], 0 }
   0x2   :  { %14 = vsyncpa [#allocation6], 0 }
   0x3   :  { %15 = vsyncpa [#allocation4], 0 }
   0x4   :  { %17 = vsyncpa [#allocation4 + $0x1], 0 }
   0x5   :  { %18 = vsyncpa [#allocation10], 0  ;;  %s1084_s18 = smov 0   ;;  %s1086_s19 = smov 0  }
   0x6   :  { %s1088_s20 = smov 0   ;;  %s1090_s21 = smov 0  }
   0x7 LB: > { %s1105_s22 = sadd.s32 4294967295, %s1043_s21   ;;  %s630_s23 = sadd.s32 4294967294, %s1043_s21   ;;  %s1043_s21 = sphi %s1090_s21, %s1299_s21   ;;  %s1039_s20 = sphi %s1088_s20, %s1298_s20   ;;  %s1035_s19 = sphi %s1086_s19, %s1297_s19   ;;  %s1031_s18 = sphi %s1084_s18, %s1296_s18  }
   0x8   : > { %p44_p0 = scmp.ne.s32.totalorder %s1035_s19, %s1031_s18  ;;  %p45_p1 = scmp.eq.s32.totalorder %s1105_s22, 0 }
   0x9   : > { %p1282_p2 = scmp.eq.s32.totalorder %s1105_s22, 3  ;;  %p116_p3 = scmp.eq.s32.totalorder %s630_s23, 3 }
   0xa   : > { %p1114_p4 = por %p45_p1, %p44_p0  ;;  %p631_p5 = scmp.ge.s32.totalorder %s1043_s21, 1 }
   0xb   : > { %p1119_p6 = por %p116_p3, %p44_p0  ;;  %p165_p7 = scmp.lt.s32.totalorder %s1043_s21, 5 }
   0xc   : > { %s176_s28 = sshll.u32 %s1276_s1, 4  ;;  %s1045_s30 = smov [#allocation5]   ;;  %s177_s28 = int_to_ptr.hbm [resolvable:$true] %s176_s28 }
   0xd   : > { %p1128_p9 = pnand %p631_p5, %p165_p7  ;;  %s178_s6 = sshll.u32 %s1045_s30, 4  ;;  %s179_s6 = int_to_ptr.vmem [resolvable:$true] %s178_s6 }
   0xe   : > { %s191_s9 = sshll.u32 %s1277_s2, 4  ;;  %s1281_s10 = smov 128   ;;  %s192_s9 = int_to_ptr.hbm [resolvable:$true] %s191_s9 }
   0xf   : > { %p757_p10 = pneg %p1128_p9  ;;  %s1047_s11 = smov 8  }
  0x10   : > { %s1048_s12 = smov [#allocation7]   ;;  %s1143_s14 = sadd.s32 1, %s1043_s21  }
  0x11   : > { %p758_p11 = pnand %p757_p10, %p45_p1  ;;  %s193_s13 = sshll.u32 %s1048_s12, 4  ;;  %s194_s13 = int_to_ptr.vmem [resolvable:$true] %s193_s13 }
  0x12   : > { %s31_s15 = sadd.s32 1, %s1039_s20  ;;  %s28_s16 = ssub.s32 %s1043_s21, %s1143_s14 }
  0x13   : > { %760 = dma.hbm_to_vmem [thread:$0]  (!%p758_p11), %s177_s28, 2048, %s179_s6, [#allocation6], %s1281_s10, %s1281_s10, %s1047_s11  }
  0x14   : > { %763 = dma.hbm_to_vmem [thread:$0]  (!%p758_p11), %s192_s9, 32, %s194_s13, [#allocation6]  }
  0x15   : > { %p38_p12 = scmp.ne.s32.totalorder %s1039_s20, %s1035_s19  ;;  %p29_p13 = scmp.eq.s32.totalorder %s28_s16, 0 }
  0x16   : > { %p39_p0 = scmp.eq.s32.totalorder %s1043_s21, 0  ;;  %p774_p5 = scmp.lt.s32.totalorder %s1043_s21, 4 }
  0x17   : > { %p1153_p3 = por %p1282_p2, %p38_p12  ;;  %s204_s26 = sand.u32 1, %s1039_s20  }
  0x18   : > { %s1159_s23 = scalar_select %p29_p13, %s1039_s20, %s31_s15  }
  0x19   : > { %p40_p7 = por %p39_p0, %p38_p12  ;;  %s635_s27 = sshll.u32 %s204_s26, 4 }
  0x1a   : > { %s718_s28 = sshll.u32 %s1043_s21, 4  ;;  %s208_s8 = scalar_lea.vmem [#allocation2], %s635_s27 }
  0x1b   : > { %s213_s7 = scalar_lea.hbm %s1275_s0, %s718_s28  ;;  %s216_s9 = sshll.u32 %s208_s8, 4  ;;  %s217_s9 = int_to_ptr.vmem [resolvable:$true] %s216_s9 }
  0x1c   : > { %s214_s12 = sshll.u32 %s213_s7, 4  ;;  %p1166_p10 = pnand %p774_p5, %p40_p7  ;;  %s215_s12 = int_to_ptr.hbm [resolvable:$true] %s214_s12 }
  0x1d   : > { %s205_s15 = scalar_lea.sflag [#allocation3], %s204_s26  ;;  %s883_s16 = sshra.s32 %s215_s12, 4  ;;  %s884_s16 = int_to_ptr.hbm [resolvable:$true] %s883_s16 }
  0x1e   : > { %s885_s10 = scalar_lea.hbm %s884_s16, 16  ;;  %p887_p12 = pneg %p1166_p10 }
  0x1f   : > { %p886_p11 = scmp.ne.s32.totalorder %s884_s16, %s885_s10  ;;  %s890_s30 = scalar_lea.hbm %s1275_s0, 64 }
  0x20   : > { %p891_p5 = scmp.lt.s32.totalorder %s884_s16, %s1275_s0  ;;  %p892_p7 = scmp.lt.s32.totalorder %s890_s30, %s885_s10 }
  0x21   : > { %p888_p13 = pnand %p887_p12, %p886_p11 }
  0x22   : > { %p893_p2 = por %p892_p7, %p891_p5 }
  0x23   : > { %p889_p0 = pneg %p888_p13 }
  0x25   : > { %p894_p8 = pnand %p893_p2, %p889_p0 }
  0x27   : > { %897 = shalt.err (!%p894_p8)
}
  0x28   : > { %s1288_s26 = smov 128   ;;  %228 = sbr.rel (%p1128_p9) target bundleno = 258 (0x102), region = 32 }
  0x29   : > { %767 = dma.hbm_to_vmem [thread:$0]  (!%p1166_p10), %s215_s12, 256, %s217_s9, %s205_s15, %s1288_s26, %s1288_s26, %s1047_s11  }
  0x2a   : > { %s1186_s8 = sand.u32 (!%p1128_p9), 1, %s1035_s19  }
  0x2b   : > { %s639_s16 = sshll.u32 (!%p1128_p9), %s1186_s8, 4  ;;  %s231_s10 = scalar_lea.sflag (!%p1128_p9), [#allocation3], %s1186_s8 }
  0x2c   : > { %s1190_s28 = scalar_lea.vmem (!%p1128_p9), [#allocation2], %s639_s16 }
  0x2d   : > { %1014 = dma.done.wait (%p1114_p4), %s231_s10, 256  }
  0x2e   : > { %1016 = vsyncadd (%p1114_p4), %s231_s10, 4294967040 }
  0x2f   : > { %1018 = dma.done.wait (%p45_p1), [#allocation6], 2080  }
  0x30   : > { %1020 = vsyncadd (%p45_p1), [#allocation6], 4294965216  ;;  %s642_s29 = sshll.u32 %s1186_s8, 5  ;;  %p1289_p2 = scmp.ne.s32.totalorder %s1105_s22, 0 }
  0x31   : > { %s1201_s11 = scalar_lea.vmem [#allocation8], %s642_s29 }
  0x32   : > { %277 = sbr.rel (%p1289_p2) target bundleno = 60 (0x3c), region = 48 }
  0x37   : > { %v278_v0 = vlaneseq  ;;  %v1049_v1 = vmov 0.0  }
  0x39   : > { %vm280_vm0 = vcmp.lt.s32.totalorder %v278_v0, 256 }
  0x3a   : > { %282 = vst.msk [vmem:[#allocation9] sm:$0x3] %vm280_vm0, %v1049_v1 }
  0x3b   : > { %283 = vst.msk [vmem:[#allocation11] sm:$0x3] %vm280_vm0, %v1049_v1 }
  0x3c PF: > { %v702_v2 = vld [vmem:[#allocation5 + $0x70] sm:$0xf]  ;;  %v734_v3 = vld [vmem:[#allocation5 + $0x74] sm:$0xf0]  ;;  %v733_v4 = vld [vmem:[#allocation5 + $0x74] sm:$0xf] }
  0x3d   : > { %v703_v5 = vor.u32 %v734_v3, %v702_v2  ;;  %v704_v6 = vld [vmem:[#allocation5 + $0x78] sm:$0xf0]  ;;  %v694_v7 = vld [vmem:[#allocation5 + $0x60] sm:$0xf]  ;;  %v732_v8 = vld [vmem:[#allocation5 + $0x64] sm:$0xf0] }
  0x3e   : > { %v707_v9 = vor.u32 %v733_v4, %v704_v6  ;;  %v731_v10 = vld [vmem:[#allocation5 + $0x64] sm:$0xf]  ;;  %v696_v11 = vld [vmem:[#allocation5 + $0x68] sm:$0xf0]  ;;  %v695_v12 = vor.u32 %v732_v8, %v694_v7  ;;  %v686_v14 = vld [vmem:[#allocation5 + $0x50] sm:$0xf] }
  0x3f   : > { %389 = vmatpush.bf16.msra.mxu0 %v703_v5  ;;  %v699_v13 = vor.u32 %v731_v10, %v696_v11  ;;  %v730_v15 = vld [vmem:[#allocation5 + $0x54] sm:$0xf0]  ;;  %v729_v16 = vld [vmem:[#allocation5 + $0x54] sm:$0xf]  ;;  %v688_v17 = vld [vmem:[#allocation5 + $0x58] sm:$0xf0] }
  0x40   : > { %403 = vmatpush.bf16.msra.mxu1 %v707_v9  ;;  %v687_v18 = vor.u32 %v730_v15, %v686_v14  ;;  %v691_v19 = vor.u32 %v729_v16, %v688_v17  ;;  %v678_v20 = vld [vmem:[#allocation5 + $0x40] sm:$0xf]  ;;  %v728_v21 = vld [vmem:[#allocation5 + $0x44] sm:$0xf0]  ;;  %v727_v22 = vld [vmem:[#allocation5 + $0x44] sm:$0xf] }
  0x41   : > { %v680_v23 = vld [vmem:[#allocation5 + $0x48] sm:$0xf0]  ;;  %v679_v24 = vor.u32 %v728_v21, %v678_v20  ;;  %v670_v26 = vld [vmem:[#allocation5 + $0x30] sm:$0xf]  ;;  %v726_v27 = vld [vmem:[#allocation5 + $0x34] sm:$0xf0] }
  0x42   : > { %v683_v25 = vor.u32 %v727_v22, %v680_v23  ;;  %v725_v28 = vld [vmem:[#allocation5 + $0x34] sm:$0xf]  ;;  %v672_v29 = vld [vmem:[#allocation5 + $0x38] sm:$0xf0]  ;;  %v671_v30 = vor.u32 %v726_v27, %v670_v26  ;;  %v662_v32 = vld [vmem:[#allocation5 + $0x20] sm:$0xf] }
  0x43   : > { %390 = vmatpush.bf16.msra.mxu0 %v695_v12  ;;  %v675_v31 = vor.u32 %v725_v28, %v672_v29  ;;  %v724_v33 = vld [vmem:[#allocation5 + $0x24] sm:$0xf0]  ;;  %v723_v34 = vld [vmem:[#allocation5 + $0x24] sm:$0xf]  ;;  %v664_v35 = vld [vmem:[#allocation5 + $0x28] sm:$0xf0] }
  0x44   : > { %404 = vmatpush.bf16.msra.mxu1 %v699_v13  ;;  %v663_v36 = vor.u32 %v724_v33, %v662_v32  ;;  %v667_v37 = vor.u32 %v723_v34, %v664_v35  ;;  %v654_v38 = vld [vmem:[#allocation5 + $0x10] sm:$0xf]  ;;  %v722_v39 = vld [vmem:[#allocation5 + $0x14] sm:$0xf0]  ;;  %v721_v40 = vld [vmem:[#allocation5 + $0x14] sm:$0xf] }
  0x45   : > { %v656_v41 = vld [vmem:[#allocation5 + $0x18] sm:$0xf0]  ;;  %v655_v42 = vor.u32 %v722_v39, %v654_v38  ;;  %v646_v44 = vld [vmem:[#allocation5] sm:$0xf]  ;;  %v720_v45 = vld [vmem:[#allocation5 + $0x4] sm:$0xf0] }
  0x46   : > { %v659_v43 = vor.u32 %v721_v40, %v656_v41  ;;  %v719_v46 = vld [vmem:[#allocation5 + $0x4] sm:$0xf]  ;;  %v648_v47 = vld [vmem:[#allocation5 + $0x8] sm:$0xf0]  ;;  %v647_v48 = vor.u32 %v720_v45, %v646_v44  ;;  %v303_v53 = vld [vmem:[#allocation7] sm:$0x3] }
  0x47   : > { %391 = vmatpush.bf16.msra.mxu0 %v687_v18  ;;  %v284_v49 = vld [vmem:[%s1190_s28] sm:$0xff]  ;;  %v285_v50 = vld [vmem:[%s1190_s28 + $0x8] sm:$0xff]  ;;  %v651_v51 = vor.u32 %v719_v46, %v648_v47  ;;  %v305_v54 = vperm.slane %v303_v53, 0  ;;  %v306_v55 = vperm.slane %v303_v53, 1  ;;  %s736_s24 = sshll.u32 %s1105_s22, 5  ;;  %s488_s15 = sshll.u32 %s1201_s11, 4  ;;  %s1214_s15 = int_to_ptr.vmem [resolvable:$true] %s488_s15 }
  0x48   : > { %405 = vmatpush.bf16.msra.mxu1 %v691_v19  ;;  %v286_v52 = vpack.c.bf16 %v285_v50, %v284_v49  ;;  %s487_s13 = scalar_lea.hbm %s1278_s3, %s736_s24  ;;  %s475_s30 = scalar_lea.sflag [#allocation4], %s1186_s8 }
  0x49   : > { %s490_s27 = sshll.u32 %s487_s13, 4  ;;  %s933_s10 = scalar_lea.hbm %s1278_s3, 128  ;;  %s1216_s27 = int_to_ptr.hbm [resolvable:$true] %s490_s27 }
  0x4a   : > { %s927_s6 = sshra.s32 %s1216_s27, 4  ;;  %s928_s6 = int_to_ptr.hbm [resolvable:$true] %s927_s6 }
  0x4b   : > { %392 = vmatpush.bf16.msra.mxu0 %v679_v24  ;;  %s929_s7 = scalar_lea.hbm %s928_s6, 32  ;;  %p934_p9 = scmp.lt.s32.totalorder %s928_s6, %s1278_s3 }
  0x4c   : > { %406 = vmatpush.bf16.msra.mxu1 %v683_v25  ;;  %p930_p1 = scmp.ne.s32.totalorder %s928_s6, %s929_s7  ;;  %p935_p10 = scmp.lt.s32.totalorder %s933_s10, %s929_s7 }
  0x4e   : > { %p931_p4 = pnand %p930_p1, %p1153_p3  ;;  %p936_p11 = por %p935_p10, %p934_p9 }
  0x4f   : > { %393 = vmatpush.bf16.msra.mxu0 %v671_v30 }
  0x50   : > { %407 = vmatpush.bf16.msra.mxu1 %v675_v31  ;;  %p932_p8 = pneg %p931_p4 }
  0x52   : > { %p937_p12 = pnand %p936_p11, %p932_p8 }
  0x53   : > { %394 = vmatpush.bf16.msra.mxu0 %v663_v36 }
  0x54   : > { %408 = vmatpush.bf16.msra.mxu1 %v667_v37 }
  0x57   : > { %395 = vmatpush.bf16.msra.mxu0 %v655_v42 }
  0x58   : > { %409 = vmatpush.bf16.msra.mxu1 %v659_v43 }
  0x5b   : > { %396 = vmatpush.bf16.msra.mxu0 %v647_v48 }
  0x5c   : > { %410 = vmatpush.bf16.msra.mxu1 %v651_v51 }
  0x5e   : > { %397 = vmatmul.bf16.vlgmr.msra.gmra.mxu0 %v286_v52 }
  0x5f   : > { %411 = vmatmul.bf16.vlgmr.msra.gmra.mxu1 %v286_v52 }
  0xdb   : > { %v398_v56 = vpop.f32.mrf.mxu0 }
  0xdc   : > { %v399_v57 = vadd.f32 %v398_v56, %v305_v54  ;;  %v412_v58 = vpop.f32.mrf.mxu1 }
  0xdd   : > { %v413_v59 = vadd.f32 %v412_v58, %v306_v55 }
  0xde   : > { %417 = vst [vmem:[%s1201_s11] sm:$0xff] %v399_v57  ;;  %v449_v0 = vmul.f32 %v399_v57, %v399_v57 }
  0xdf   : > { %418 = vst [vmem:[%s1201_s11 + $0x8] sm:$0xff] %v413_v59  ;;  %v450_v3 = vmul.f32 %v413_v59, %v413_v59 }
  0xe3   : > { %v400_v60 = vpop.f32.mrf.mxu0 }
  0xe4   : > { %v401_v61 = vadd.f32 %v400_v60, %v305_v54  ;;  %v414_v62 = vpop.f32.mrf.mxu1 }
  0xe5   : > { %v415_v63 = vadd.f32 %v414_v62, %v306_v55 }
  0xe6   : > { %419 = vst [vmem:[%s1201_s11 + $0x10] sm:$0xff] %v401_v61  ;;  %v422_v1 = vadd.f32 %v401_v61, %v399_v57  ;;  %v451_v2 = vmul.f32 %v401_v61, %v401_v61 }
  0xe7   : > { %420 = vst [vmem:[%s1201_s11 + $0x18] sm:$0xff] %v415_v63  ;;  %v429_v4 = vadd.f32 %v415_v63, %v413_v59  ;;  %v452_v5 = vmul.f32 %v415_v63, %v415_v63 }
  0xe8   : > { %v423_v6 = vrot.slane %v422_v1, 4  ;;  %v453_v7 = vadd.f32 %v451_v2, %v449_v0 }
  0xe9   : > { %940 = shalt.err (!%p937_p12)
}
  0xea   : > { %s1050_s8 = smov 256   ;;  %s1051_s11 = smov 16   ;;  %v430_v8 = vrot.slane %v429_v4, 4  ;;  %v460_v9 = vadd.f32 %v452_v5, %v450_v3  ;;  %v424_v10 = vadd.f32 %v423_v6, %v422_v1  ;;  %v454_v11 = vrot.slane %v453_v7, 4  ;;  %v421_v30 = vld [vmem:[#allocation9] sm:$0x3] }
  0xeb   : > { %747 = dma.vmem_to_hbm [thread:$0]  (%p1153_p3), %s1214_s15, 512, %s1216_s27, %s475_s30, %s1050_s8, %s1050_s8, %s1051_s11   ;;  %v443_v29 = vlaneseq  ;;  %vm439_vm1 = vcmask 1040384   ;;  %v448_v36 = vld [vmem:[#allocation11] sm:$0x3] }
  0xec   : > { %v431_v12 = vadd.f32 %v430_v8, %v429_v4  ;;  %v461_v13 = vrot.slane %v460_v9, 4  ;;  %v425_v14 = vrot.slane %v424_v10, 2  ;;  %v455_v15 = vadd.f32 %v454_v11, %v453_v7  ;;  %s1052_s17 = smov [#allocation9]   ;;  %s505_s13 = sshll.u32 %s1279_s4, 4  ;;  %s506_s13 = int_to_ptr.hbm [resolvable:$true] %s505_s13 }
  0xed   : > { %s503_s24 = sshll.u32 %s1052_s17, 4  ;;  %vm1238_vm2 = vcmp.lt.s32.totalorder %v443_v29, 256  ;;  %s1053_s15 = smov [#allocation11]   ;;  %s504_s24 = int_to_ptr.vmem [resolvable:$true] %s503_s24 }
  0xee   : > { %v432_v16 = vrot.slane %v431_v12, 2  ;;  %v462_v17 = vadd.f32 %v461_v13, %v460_v9  ;;  %v426_v18 = vadd.f32 %v425_v14, %v424_v10  ;;  %v456_v19 = vrot.slane %v455_v15, 2  ;;  %s515_s27 = sshll.u32 %s1053_s15, 4  ;;  %s517_s7 = sshll.u32 %s1280_s5, 4  ;;  %s516_s27 = int_to_ptr.vmem [resolvable:$true] %s515_s27  ;;  %s518_s7 = int_to_ptr.hbm [resolvable:$true] %s517_s7 }
  0xef   : > { %p1292_p3 = scmp.eq.s32.totalorder %s1105_s22, 3 }
  0xf0   : > { %v433_v20 = vadd.f32 %v432_v16, %v431_v12  ;;  %v463_v21 = vrot.slane %v462_v17, 2  ;;  %v457_v22 = vadd.f32 %v456_v19, %v455_v15  ;;  %v427_v23 = vrot.slane %v426_v18, 1 }
  0xf1   : > { %p1293_p13 = pmov %p1292_p3  ;;  %p1294_p0 = pmov %p1292_p3 }
  0xf2   : > { %v434_v24 = vrot.slane %v433_v20, 1  ;;  %v464_v25 = vadd.f32 %v463_v21, %v462_v17  ;;  %v458_v26 = vrot.slane %v457_v22, 1  ;;  %v428_v31 = vadd.f32 %v427_v23, %v426_v18 }
  0xf4   : > { %v465_v27 = vrot.slane %v464_v25, 1  ;;  %v435_v28 = vadd.f32 %v434_v24, %v433_v20  ;;  %v459_v37 = vadd.f32 %v458_v26, %v457_v22 }
  0xf6   : > { %v438_v32 = vrot.slane %v435_v28, 7  ;;  %v466_v33 = vadd.f32 %v465_v27, %v464_v25 }
  0xf8   : > { %v440_v34 = vsel %vm439_vm1, %v428_v31, %v438_v32  ;;  %v469_v38 = vrot.slane %v466_v33, 7 }
  0xf9   : > { %v442_v39 = vadd.f32 %v440_v34, %v421_v30 }
  0xfa   : > { %v470_v40 = vsel %vm439_vm1, %v459_v37, %v469_v38 }
  0xfb   : > { %447 = vst.msk [vmem:[#allocation9] sm:$0x3] %vm1238_vm2, %v442_v39  ;;  %v472_v41 = vadd.f32 %v470_v40, %v448_v36 }
  0xfc   : > { %749 = dma.vmem_to_hbm [thread:$0]  (%p1292_p3), %s504_s24, 32, %s506_s13, [#allocation10]  }
  0xfd   : > { %473 = vst.msk [vmem:[#allocation11] sm:$0x3] %vm1238_vm2, %v472_v41 }
  0xfe   : > { %751 = dma.vmem_to_hbm [thread:$0]  (%p1293_p13), %s516_s27, 32, %s518_s7, [#allocation10]  }
  0xff   : > { %1022 = dma.done.wait (%p1294_p0), [#allocation10], 64   ;;  %p1295_p5 = pmov %p1294_p0 }
 0x101   : > { %1024 = vsyncadd (%p1295_p5), [#allocation10], 4294967232 }
 0x102 PF: > { %p781_p7 = scmp.ge.s32.totalorder %s1043_s21, 2  ;;  %s539_s26 = sand.u32 1, %s1031_s18  }
 0x103   : > { %s540_s16 = scalar_lea.sflag [#allocation4], %s539_s26 }
 0x104   : > { %p769_p2 = pnand %p781_p7, %p1119_p6 }
 0x106   : > { %p770_p1 = pneg %p769_p2 }
 0x108   : > { %1026 = dma.done.wait (%p770_p1), %s540_s16, 512  }
 0x109   : > { %1028 = vsyncadd (%p770_p1), %s540_s16, 4294966784  ;;  %p21_p4 = scmp.ge.s32.totalorder %s1143_s14, 6   ;;  %s1296_s18 = smov %s1035_s19 }
 0x10a   : > { %s1297_s19 = smov %s1039_s20  ;;  %s1298_s20 = smov %s1159_s23 }
 0x10b   : > { %s1299_s21 = smov %s1143_s14  ;;  %23 = sbr.rel (!%p21_p4) target bundleno = 7 (0x7), region = 105 }
 0x110   :  { %546 = vsyncpa [#allocation3], 1 }
 0x111   :  { %548 = vsyncpa [#allocation3 + $0x1], 1 }
 0x112   :  { %549 = vsyncpa [#allocation6], 1 }
 0x113   :  { %550 = vsyncpa [#allocation4], 1 }
 0x114   :  { %552 = vsyncpa [#allocation4 + $0x1], 1 }
 0x115   :  { %553 = vsyncpa [#allocation10], 1 }

</bundles_post_ra>
